<compile_context>
chip_gen: v5e
topology: v5e:2x2
jax: 0.10.0
libtpu: 0.0.40
codegen_flags: <defaults>
</compile_context>

<pallas_src>
import jax
import jax.numpy as jnp
from jax.experimental import pallas as pl
from jax.experimental.pallas import tpu as pltpu


def _round_up(a, m):
    return -(-a // m) * m


def _sgc_kernel(x_ref, w2_ref, b2_ref, o_ref):
    # x_ref:  (tm, V*Cin)       row block of flattened (n, t) rows
    # w2_ref: (V*Cin, Cpad)     fused conv-weight x adjacency (resident)
    # b2_ref: (1, Cpad)         fused bias (resident)
    # o_ref:  (tm, Cpad)        lane-dense output block (Cpad % 128 == 0)
    y = jnp.dot(x_ref[...], w2_ref[...], preferred_element_type=jnp.float32)
    y = y + b2_ref[...].astype(jnp.float32)
    o_ref[...] = y.astype(o_ref.dtype)


def _fold_params(A, weight, bias, *, K, Cout, Cin, V, act_dtype):
    """Fold Conv2d(Cin, K*Cout, 1) weight/bias with the adjacency stack."""
    wk = weight.astype(jnp.float32).reshape(K, Cout, Cin)
    bk = bias.astype(jnp.float32).reshape(K, Cout)
    Af = A[:K].astype(jnp.float32)
    # Fold in f32, cast to the activation dtype last (single rounding).
    W2 = jnp.einsum('kci,kvw->vicw', wk, Af).reshape(V * Cin, Cout * V)
    b2 = jnp.einsum('kc,kvw->cw', bk, Af).reshape(1, Cout * V)
    W2 = W2.astype(act_dtype)
    b2 = b2.astype(act_dtype)
    # Lane-pad the output axis to a multiple of 128 -> unmasked full-lane vst.
    CV = Cout * V
    Cpad = _round_up(CV, 128)
    if Cpad != CV:
        W2 = jnp.pad(W2, ((0, 0), (0, Cpad - CV)))
        b2 = jnp.pad(b2, ((0, 0), (0, Cpad - CV)))
    return W2, b2, Cpad


def _sgc_rows(xm, W2, b2, *, tm=None, out_dtype=None):
    """Row GEMM: (M, V*Cin) @ (V*Cin, Cpad) + b2 -> (M, Cpad).  M % 8 == 0."""
    M, KD = xm.shape
    Cpad = W2.shape[1]
    out_dtype = xm.dtype if out_dtype is None else out_dtype
    in_item = jnp.dtype(xm.dtype).itemsize
    out_item = jnp.dtype(out_dtype).itemsize

    # Row tile: big to amortize per-step overhead, but guarantee >= 2 grid
    # blocks so both v7x TensorCores get work, and stay within VMEM budget.
    if tm is None:
        tm = 1024
    tm = min(tm, M)
    if M >= 16:
        tm = min(tm, _round_up(pl.cdiv(M, 2), 8))
    tm = max(8, _round_up(tm, 8))

    def footprint(t):
        # resident W2/b2 + double-buffered x/out tiles + f32 dot result
        return (KD * Cpad * in_item + Cpad * in_item
                + 2 * t * KD * in_item + 2 * t * Cpad * out_item
                + t * Cpad * 4)

    vmem_budget = 12 * 1024 * 1024  # stay inside v5e's 16 MiB default scope
    while tm > 8 and footprint(tm) > vmem_budget:
        tm = max(8, _round_up(tm // 2, 8))

    vmem_limit = None
    if footprint(tm) > vmem_budget:
        # Resident W2 dominates; raise scoped VMEM (kept below v7x's 64 MiB).
        # TODO(synk): for configs where W2 alone approaches physical VMEM
        # (e.g. V=25, Cin=Cout=256) switch to a K-tiled contraction grid with
        # a VMEM f32 accumulator (pl.when init/finalize, axis "arbitrary").
        vmem_limit = min(56 * 1024 * 1024, int(footprint(tm)) + (4 << 20))

    params = dict(dimension_semantics=("parallel",))
    if vmem_limit is not None:
        params["vmem_limit_bytes"] = vmem_limit

    return pl.pallas_call(
        _sgc_kernel,
        out_shape=jax.ShapeDtypeStruct((M, Cpad), out_dtype),
        grid=(pl.cdiv(M, tm),),
        in_specs=[
            pl.BlockSpec((tm, KD), lambda i: (i, 0)),
            pl.BlockSpec((KD, Cpad), lambda i: (0, 0)),   # resident weights
            pl.BlockSpec((1, Cpad), lambda i: (0, 0)),    # resident bias
        ],
        out_specs=pl.BlockSpec((tm, Cpad), lambda i: (i, 0)),
        compiler_params=pltpu.CompilerParams(**params),
    )(xm, W2, b2)


def spatial_graph_conv_ntvc(x_ntvc, A, weight, bias, *, max_graph_distance,
                            out_channels, tm=None, out_dtype=None):
    """Channels-last fast path: x (N, T, V, Cin) -> y (N, T, Cout, V).

    No HBM-level transposes; preferred entry point when the surrounding model
    keeps activations in (N, T, V, C) layout.
    """
    K = max_graph_distance + 1
    Cout = out_channels
    N, T, V, Cin = x_ntvc.shape
    assert weight.shape == (K * Cout, Cin)
    assert bias.shape == (K * Cout,)

    W2, b2, _ = _fold_params(A, weight, bias, K=K, Cout=Cout, Cin=Cin, V=V,
                             act_dtype=x_ntvc.dtype)

    M = N * T
    xm = x_ntvc.reshape(M, V * Cin)           # v-major / i-minor, matches W2
    M_pad = _round_up(M, 8)
    if M_pad != M:
        xm = jnp.pad(xm, ((0, M_pad - M), (0, 0)))   # <= 7 rows of padding

    out = _sgc_rows(xm, W2, b2, tm=tm, out_dtype=out_dtype)
    return out[:M, :Cout * V].reshape(N, T, Cout, V)


def spatial_graph_conv(x, A, weight, bias, *, max_graph_distance, out_channels,
                       tm=None, out_dtype=None):
    """PyTorch-layout wrapper: x (N, Cin, T, V) -> y (N, Cout, T, V).

    TODO(synk): inside a larger model, call spatial_graph_conv_ntvc directly
    and keep activations in (N, T, V, C) between layers; the NCHW<->NTVC
    transposes here roughly double HBM traffic on this memory-bound op.
    """
    K = max_graph_distance + 1
    Cout = out_channels
    N, Cin, T, V = x.shape
    assert weight.shape == (K * Cout, Cin)
    assert bias.shape == (K * Cout,)

    x_ntvc = jnp.transpose(x, (0, 2, 3, 1))              # (N, T, V, Cin)
    y = spatial_graph_conv_ntvc(x_ntvc, A, weight, bias,
                                max_graph_distance=max_graph_distance,
                                out_channels=Cout, tm=tm, out_dtype=out_dtype)
    return jnp.transpose(y, (0, 2, 1, 3))                # (N, Cout, T, V)


def _reference(x, A, weight, bias, K, Cout):
    # Pure-JAX reference mirroring the PyTorch forward (unfused).
    h = jnp.einsum('nitv,oi->notv', x, weight) + bias[None, :, None, None]
    N, KC, T, V = h.shape
    h = h.reshape(N, K, Cout, T, V)
    return jnp.einsum('nkctv,kvw->nctw', h, A[:K])


if __name__ == "__main__":
    # Small shapes consistent with the module's forward.
    N, Cin, T, V = 2, 4, 16, 16
    max_graph_distance = 2
    K = max_graph_distance + 1
    Cout = 8  # Cout * V = 128 -> exactly one lane-dense output register width

    key = jax.random.PRNGKey(0)
    kx, ka, kw, kb = jax.random.split(key, 4)
    x = jax.random.normal(kx, (N, Cin, T, V), dtype=jnp.float32)
    A = jax.random.normal(ka, (K, V, V), dtype=jnp.float32)
    # Deterministic synthetic Conv2d(Cin, K*Cout, 1) parameters (no checkpoint).
    weight = jax.random.normal(kw, (K * Cout, Cin), dtype=jnp.float32) * 0.1
    bias = jax.random.normal(kb, (K * Cout,), dtype=jnp.float32) * 0.1

    # PyTorch-layout path (module semantics).
    y = spatial_graph_conv(x, A, weight, bias,
                           max_graph_distance=max_graph_distance,
                           out_channels=Cout)
    y = jax.block_until_ready(y)

    y_ref = _reference(x, A, weight, bias, K, Cout)
    assert y.shape == (N, Cout, T, V)
    assert jnp.allclose(y, y_ref, atol=1e-4, rtol=1e-4), "mismatch vs reference"

    # Channels-last fast path (no transposes) should agree as well.
    y2 = spatial_graph_conv_ntvc(jnp.transpose(x, (0, 2, 3, 1)), A, weight,
                                 bias, max_graph_distance=max_graph_distance,
                                 out_channels=Cout)
    y2 = jax.block_until_ready(y2)
    assert jnp.allclose(jnp.transpose(y2, (0, 2, 1, 3)), y_ref,
                        atol=1e-4, rtol=1e-4), "ntvc path mismatch"

    print("KERNEL_OK")
</pallas_src>

<mosaic_0001>
module attributes {stable_mosaic.version = 11 : i64} {
  func.func @_sgc_kernel(%arg0: i32, %arg1: memref<16x64xf32, #tpu.memory_space<vmem>>, %arg2: memref<64x128xf32, #tpu.memory_space<vmem>>, %arg3: memref<1x128xf32, #tpu.memory_space<vmem>>, %arg4: memref<16x128xf32, #tpu.memory_space<vmem>>) attributes {dimension_semantics = [#tpu.dimension_semantics<parallel>], iteration_bounds = array<i64: 2>, scalar_prefetch = 0 : i64, scratch_operands = 0 : i64, tpu.core_type = #tpu.core_type<tc>, window_params = [{transform_indices = @transform_0, window_bounds = array<i64: 16, 64>}, {pipeline_mode = #tpu.pipeline_mode<synchronous>, transform_indices = @transform_1, window_bounds = array<i64: 64, 128>}, {pipeline_mode = #tpu.pipeline_mode<synchronous>, transform_indices = @transform_2, window_bounds = array<i64: 1, 128>}, {transform_indices = @transform_3, window_bounds = array<i64: 16, 128>}]} {
    %c0 = arith.constant 0 : index
    %c0_0 = arith.constant 0 : index
    %0 = vector.load %arg1[%c0, %c0_0] : memref<16x64xf32, #tpu.memory_space<vmem>>, vector<16x64xf32>
    %c0_1 = arith.constant 0 : index
    %c0_2 = arith.constant 0 : index
    %1 = vector.load %arg2[%c0_1, %c0_2] : memref<64x128xf32, #tpu.memory_space<vmem>>, vector<64x128xf32>
    %cst = arith.constant dense<0.000000e+00> : vector<16x128xf32>
    %2 = tpu.matmul %0, %1, %cst {dimension_numbers = #tpu.dot_dimension_numbers<[1], [0], [0], [1], [0, 0, 1, 1], [], []>} : vector<16x64xf32>, vector<64x128xf32>, vector<16x128xf32> -> vector<16x128xf32>
    %c0_3 = arith.constant 0 : index
    %c0_4 = arith.constant 0 : index
    %3 = vector.load %arg3[%c0_3, %c0_4] : memref<1x128xf32, #tpu.memory_space<vmem>>, vector<1x128xf32>
    %4 = vector.broadcast %3 : vector<1x128xf32> to vector<16x128xf32>
    %5 = arith.addf %2, %4 : vector<16x128xf32>
    %c0_5 = arith.constant 0 : index
    %c0_6 = arith.constant 0 : index
    %6 = vector.load %arg4[%c0_5, %c0_6] : memref<16x128xf32, #tpu.memory_space<vmem>>, vector<16x128xf32>
    tpu.vector_store %arg4[%c0_5, %c0_6], %5 {strides = array<i32>} : memref<16x128xf32, #tpu.memory_space<vmem>>, vector<16x128xf32>,
    return
  }
  func.func @transform_0(%arg0: i32) -> (i32, i32) {
    %c0_i32 = arith.constant 0 : i32
    %c0_i32_0 = arith.constant 0 : i32
    return %arg0, %c0_i32 : i32, i32
  }
  func.func @transform_1(%arg0: i32) -> (i32, i32) {
    %c0_i32 = arith.constant 0 : i32
    %c0_i32_0 = arith.constant 0 : i32
    %c0_i32_1 = arith.constant 0 : i32
    return %c0_i32, %c0_i32_0 : i32, i32
  }
  func.func @transform_2(%arg0: i32) -> (i32, i32) {
    %c0_i32 = arith.constant 0 : i32
    %c0_i32_0 = arith.constant 0 : i32
    %c0_i32_1 = arith.constant 0 : i32
    return %c0_i32, %c0_i32_0 : i32, i32
  }
  func.func @transform_3(%arg0: i32) -> (i32, i32) {
    %c0_i32 = arith.constant 0 : i32
    %c0_i32_0 = arith.constant 0 : i32
    return %arg0, %c0_i32 : i32, i32
  }
}

</mosaic_0001>

<bundles_post_ra>
// kernel: tpu_custom_call.1
= control target key start
LH: loop header
LB: loop body
LE: loop exit
PB: predicated region body
PF: predicated region fallthrough
CT: control target
= control target key end

     0   :  { %8 = vsyncpa [#allocation3], 0  ;;  %s753_s0 = inlined_call_operand.hbm [shape: f32[32,64], index: 0, kind: input, shape index: {}]   ;;  %s754_s1 = inlined_call_operand.hbm [shape: f32[64,128], index: 1, kind: input, shape index: {}]   ;;  %s755_s2 = inlined_call_operand.vmem [shape: f32[1,128], index: 2, kind: input, shape index: {}]   ;;  %s756_s3 = inlined_call_operand.hbm [shape: f32[32,128], index: 3, kind: output, shape index: {}]  }
   0x1   :  { %10 = vsyncpa [#allocation3 + $0x1], 0 }
   0x2   :  { %11 = vsyncpa [#allocation6], 0 }
   0x3   :  { %12 = vsyncpa [#allocation4], 0 }
   0x4   :  { %14 = vsyncpa [#allocation4 + $0x1], 0  ;;  %s602_s12 = smov 0   ;;  %s604_s13 = smov 0  }
   0x5   :  { %s606_s14 = smov 0   ;;  %s608_s15 = smov 0  }
   0x6 LB: > { %s623_s16 = sadd.s32 4294967295, %s575_s15   ;;  %s355_s17 = sadd.s32 4294967294, %s575_s15   ;;  %s575_s15 = sphi %s608_s15, %s766_s15   ;;  %s571_s14 = sphi %s606_s14, %s765_s14   ;;  %s567_s13 = sphi %s604_s13, %s764_s13   ;;  %s563_s12 = sphi %s602_s12, %s763_s12  }
   0x7   : > { %p40_p0 = scmp.ne.s32.totalorder %s567_s13, %s563_s12  ;;  %p41_p1 = scmp.eq.s32.totalorder %s623_s16, 0 }
   0x8   : > { %p106_p2 = scmp.eq.s32.totalorder %s623_s16, 1  ;;  %p112_p3 = scmp.eq.s32.totalorder %s355_s17, 1 }
   0x9   : > { %p632_p4 = por %p41_p1, %p40_p0  ;;  %p356_p5 = scmp.ge.s32.totalorder %s575_s15, 1 }
   0xa   : > { %p637_p6 = por %p112_p3, %p40_p0  ;;  %p119_p7 = scmp.lt.s32.totalorder %s575_s15, 3 }
   0xb   : > { %s130_s22 = sshll.u32 %s754_s1, 4  ;;  %s577_s24 = smov [#allocation5]   ;;  %s131_s22 = int_to_ptr.hbm [resolvable:$true] %s130_s22 }
   0xc   : > { %p645_p8 = pnand %p356_p5, %p119_p7  ;;  %s132_s25 = sshll.u32 %s577_s24, 4  ;;  %s133_s25 = int_to_ptr.vmem [resolvable:$true] %s132_s25 }
   0xd   : > { %s655_s26 = sadd.s32 1, %s575_s15   ;;  %s578_s27 = smov 128  }
   0xe   : > { %p391_p9 = pneg %p645_p8  ;;  %s579_s28 = smov 8  }
   0xf   : > { %s24_s29 = ssub.s32 %s575_s15, %s655_s26  ;;  %s27_s30 = sadd.s32 1, %s571_s14 }
  0x10   : > { %p392_p10 = pnand %p391_p9, %p41_p1  ;;  %p25_p12 = scmp.eq.s32.totalorder %s24_s29, 0 }
  0x11   : > { %p34_p13 = scmp.ne.s32.totalorder %s571_s14, %s567_s13  ;;  %p35_p0 = scmp.eq.s32.totalorder %s575_s15, 0 }
  0x12   : > { %394 = dma.hbm_to_vmem [thread:$0]  (!%p392_p10), %s131_s22, 1024, %s133_s25, [#allocation6], %s578_s27, %s578_s27, %s579_s28  }
  0x13   : > { %s667_s4 = scalar_select %p25_p12, %s571_s14, %s27_s30  }
  0x14   : > { %p671_p3 = por %p106_p2, %p34_p13  ;;  %p404_p5 = scmp.lt.s32.totalorder %s575_s15, 2 }
  0x15   : > { %s149_s6 = sand.u32 1, %s571_s14   ;;  %s373_s7 = sshll.u32 %s575_s15, 4 }
  0x16   : > { %p36_p7 = por %p35_p0, %p34_p13  ;;  %s359_s8 = sshll.u32 %s149_s6, 4 }
  0x17   : > { %s158_s11 = scalar_lea.hbm %s753_s0, %s373_s7  ;;  %s153_s20 = scalar_lea.vmem [#allocation2], %s359_s8 }
  0x18   : > { %s159_s17 = sshll.u32 %s158_s11, 4  ;;  %s161_s21 = sshll.u32 %s153_s20, 4  ;;  %s160_s17 = int_to_ptr.hbm [resolvable:$true] %s159_s17  ;;  %s162_s21 = int_to_ptr.vmem [resolvable:$true] %s161_s21 }
  0x19   : > { %p681_p9 = pnand %p404_p5, %p36_p7  ;;  %s150_s24 = scalar_lea.sflag [#allocation3], %s149_s6 }
  0x1a   : > { %s475_s25 = sshra.s32 %s160_s17, 4  ;;  %s482_s8 = scalar_lea.hbm %s753_s0, 32  ;;  %s476_s25 = int_to_ptr.hbm [resolvable:$true] %s475_s25 }
  0x1b   : > { %s477_s29 = scalar_lea.hbm %s476_s25, 16  ;;  %p479_p10 = pneg %p681_p9 }
  0x1c   : > { %p478_p2 = scmp.ne.s32.totalorder %s476_s25, %s477_s29  ;;  %p483_p0 = scmp.lt.s32.totalorder %s476_s25, %s753_s0 }
  0x1d   : > { %p484_p5 = scmp.lt.s32.totalorder %s482_s8, %s477_s29 }
  0x1e   : > { %p480_p12 = pnand %p479_p10, %p478_p2 }
  0x1f   : > { %p485_p7 = por %p484_p5, %p483_p0 }
  0x20   : > { %p481_p13 = pneg %p480_p12 }
  0x22   : > { %p486_p11 = pnand %p485_p7, %p481_p13 }
  0x24   : > { %489 = shalt.err (!%p486_p11)
}
  0x25   : > { %398 = dma.hbm_to_vmem [thread:$0]  (!%p681_p9), %s160_s17, 256, %s162_s21, %s150_s24, %s578_s27, %s578_s27, %s579_s28  }
  0x26   : > { %173 = sbr.rel (%p645_p8) target bundleno = 195 (0xc3), region = 32  ;;  %s701_s6 = sand.u32 (!%p645_p8), 1, %s567_s13  }
  0x27   : > { %s363_s11 = sshll.u32 (!%p645_p8), %s701_s6, 4  ;;  %s176_s20 = scalar_lea.sflag (!%p645_p8), [#allocation3], %s701_s6 }
  0x28   : > { %s179_s25 = scalar_lea.vmem (!%p645_p8), [#allocation2], %s363_s11 }
  0x2b   : > { %550 = dma.done.wait (%p632_p4), %s176_s20, 256  }
  0x2c   : > { %552 = vsyncadd (%p632_p4), %s176_s20, 4294967040 }
  0x2d   : > { %554 = dma.done.wait (%p41_p1), [#allocation6], 1024  }
  0x2e   : > { %556 = vsyncadd (%p41_p1), [#allocation6], 4294966272  ;;  %v219_v0 = vld [vmem:[#allocation5 + $0x38] sm:$0xff]  ;;  %v218_v1 = vld [vmem:[#allocation5 + $0x30] sm:$0xff]  ;;  %vm224_vm0 = vcmask 523264   ;;  %s374_s18 = sshll.u32 %s623_s16, 4 }
  0x2f   : > { %239 = vmatpush.msra.mxu0 %v219_v0  ;;  %375 = vmatpush.msra.mxu1 %v219_v0  ;;  %v217_v2 = vld [vmem:[#allocation5 + $0x28] sm:$0xff]  ;;  %v216_v3 = vld [vmem:[#allocation5 + $0x20] sm:$0xff]  ;;  %v215_v4 = vld [vmem:[#allocation5 + $0x18] sm:$0xff]  ;;  %s268_s28 = scalar_lea.hbm %s756_s3, %s374_s18  ;;  %s207_s22 = scalar_lea.vmem [#allocation7], %s363_s11 }
  0x30   : > { %v214_v5 = vld [vmem:[#allocation5 + $0x10] sm:$0xff]  ;;  %v213_v6 = vld [vmem:[#allocation5 + $0x8] sm:$0xff]  ;;  %v212_v7 = vld [vmem:[#allocation5] sm:$0xff]  ;;  %s269_s24 = sshll.u32 %s207_s22, 4  ;;  %s271_s29 = sshll.u32 %s268_s28, 4  ;;  %s270_s24 = int_to_ptr.vmem [resolvable:$true] %s269_s24  ;;  %s272_s29 = int_to_ptr.hbm [resolvable:$true] %s271_s29 }
  0x31   : > { %240 = vmatpush.msra.mxu0 %v218_v1  ;;  %376 = vmatpush.msra.mxu1 %v218_v1  ;;  %v210_v8 = vld [vmem:[%s179_s25] sm:$0xff]  ;;  %v211_v9 = vld [vmem:[%s179_s25 + $0x8] sm:$0xff]  ;;  %s257_s16 = scalar_lea.sflag [#allocation4], %s701_s6  ;;  %s519_s30 = sshra.s32 %s272_s29, 4  ;;  %s520_s30 = int_to_ptr.hbm [resolvable:$true] %s519_s30 }
  0x32   : > { %v444_v10 = vld [vmem:[%s755_s2] ss:$0 sm:$0xff]  ;;  %s521_s7 = scalar_lea.hbm %s520_s30, 16  ;;  %s525_s10 = scalar_lea.hbm %s756_s3, 32 }
  0x33   : > { %241 = vmatpush.msra.mxu0 %v217_v2  ;;  %377 = vmatpush.msra.mxu1 %v217_v2  ;;  %p522_p1 = scmp.ne.s32.totalorder %s520_s30, %s521_s7  ;;  %p526_p11 = scmp.lt.s32.totalorder %s520_s30, %s756_s3 }
  0x34   : > { %p527_p9 = scmp.lt.s32.totalorder %s525_s10, %s521_s7 }
  0x35   : > { %242 = vmatpush.msra.mxu0 %v216_v3  ;;  %378 = vmatpush.msra.mxu1 %v216_v3  ;;  %p523_p4 = pnand %p522_p1, %p671_p3 }
  0x36   : > { %p528_p2 = por %p527_p9, %p526_p11 }
  0x37   : > { %243 = vmatpush.msra.mxu0 %v215_v4  ;;  %379 = vmatpush.msra.mxu1 %v215_v4  ;;  %p524_p8 = pneg %p523_p4 }
  0x39   : > { %244 = vmatpush.msra.mxu0 %v214_v5  ;;  %380 = vmatpush.msra.mxu1 %v214_v5  ;;  %p529_p10 = pnand %p528_p2, %p524_p8 }
  0x3b   : > { %245 = vmatpush.msra.mxu0 %v213_v6  ;;  %381 = vmatpush.msra.mxu1 %v213_v6 }
  0x3d   : > { %246 = vmatpush.msra.mxu0 %v212_v7  ;;  %382 = vmatpush.msra.mxu1 %v212_v7 }
  0x3e   : > { %366 = vmatmul.msk.f32.vlgmr.msra.gmra.mxu0 %vm224_vm0, %v210_v8  ;;  %367 = vmatmul.msk.f32.vlgmr.msra.gmra.mxu1 %vm224_vm0, %v211_v9 }
  0xbb   : > { %v248_v11 = vpop.f32.mrf.mxu0  ;;  %v251_v12 = vpop.f32.mrf.mxu1 }
  0xbc   : > { %v249_v13 = vadd.f32 %v444_v10, %v248_v11  ;;  %v252_v14 = vadd.f32 %v444_v10, %v251_v12 }
  0xbe   : > { %254 = vst [vmem:[%s207_s22] sm:$0xff] %v249_v13 }
  0xbf   : > { %255 = vst [vmem:[%s207_s22 + $0x8] sm:$0xff] %v252_v14 }
  0xc0   : > { %532 = shalt.err (!%p529_p10)
}
  0xc1   : > { %s580_s6 = smov 128   ;;  %s581_s25 = smov 8  }
  0xc2   : > { %389 = dma.vmem_to_hbm [thread:$0]  (%p671_p3), %s270_s24, 256, %s272_s29, %s257_s16, %s580_s6, %s580_s6, %s581_s25  }
  0xc3 PF: > { %s286_s18 = sand.u32 1, %s563_s12   ;;  %p762_p12 = scmp.ge.s32.totalorder %s575_s15, 2 }
  0xc4   : > { %s287_s23 = scalar_lea.sflag [#allocation4], %s286_s18 }
  0xc5   : > { %p400_p13 = pnand %p762_p12, %p637_p6 }
  0xc7   : > { %p401_p0 = pneg %p400_p13 }
  0xc9   : > { %558 = dma.done.wait (%p401_p0), %s287_s23, 256  }
  0xca   : > { %560 = vsyncadd (%p401_p0), %s287_s23, 4294967040  ;;  %p17_p5 = scmp.ge.s32.totalorder %s655_s26, 4   ;;  %s763_s12 = smov %s567_s13 }
  0xcb   : > { %s764_s13 = smov %s571_s14  ;;  %s765_s14 = smov %s667_s4 }
  0xcc   : > { %s766_s15 = smov %s655_s26  ;;  %19 = sbr.rel (!%p17_p5) target bundleno = 6 (0x6), region = 81 }
  0xd1   :  { %293 = vsyncpa [#allocation3], 1 }
  0xd2   :  { %295 = vsyncpa [#allocation3 + $0x1], 1 }
  0xd3   :  { %296 = vsyncpa [#allocation6], 1 }
  0xd4   :  { %297 = vsyncpa [#allocation4], 1 }
  0xd5   :  { %299 = vsyncpa [#allocation4 + $0x1], 1 }

</bundles_post_ra>
